<compile_context>
chip_gen: v7x
topology: tpu7x:2x2x1
jax: 0.10.0
libtpu: 0.0.40
codegen_flags: <defaults>
</compile_context>

<pallas_src>
import numpy as np
import jax
import jax.numpy as jnp
from jax.experimental import pallas as pl
from jax.experimental.pallas import tpu as pltpu


# ------------------------------ fused kernel --------------------------------

def _encoder_kernel(x_ref, t1_ref, b1_ref, t2_ref, b2_ref, t3_ref, b3_ref,
                    t4_ref, b4_ref, wl_ref, bl_ref, o_ref):
    """Entire encoder forward: 4 x (matmul + bias + nonlin) + linear epilogue.

    Every operand is resident in VMEM; intermediates live in vregs/VMEM and
    never touch HBM.
    """
    def dense(h, t_ref, b_ref):
        return jnp.dot(h, t_ref[...],
                       preferred_element_type=jnp.float32) + b_ref[...]

    h = x_ref[...]                                   # (N, Cin*H*W)  NCHW flat
    h = jnp.maximum(dense(h, t1_ref, b1_ref), 0.0)   # (N, 256) lane-dense
    h = jnp.maximum(dense(h, t2_ref, b2_ref), 0.0)   # (N, 128) lane-dense
    h = jnp.maximum(dense(h, t3_ref, b3_ref), 0.0)   # (N, 64)
    h = jnp.tanh(dense(h, t4_ref, b4_ref))           # (N, hidden) = NCHW flatten
    o_ref[...] = dense(h, wl_ref, bl_ref)            # (N, latent)


# ---------------- weight-side lowering: conv -> dense operator ---------------

def _tap_selector(size_in, size_out):
    """sel[k, o, i] = 1  iff  i == 2*o + k - 1   (kernel 3, stride 2, pad 1)."""
    sel = np.zeros((3, size_out, size_in), np.float32)
    for k in range(3):
        for o in range(size_out):
            i = 2 * o + k - 1
            if 0 <= i < size_in:
                sel[k, o, i] = 1.0
    return sel


def _conv_as_dense(w_oihw, bias, h_in, w_in):
    """Lower Conv2d(k3, s2, p1) to a dense operator on NCHW-flattened tensors.

    T[(ci, h, w), (co, a, b)] = w[co, ci, kh, kw] with h = 2a+kh-1, w = 2b+kw-1
    (out-of-range taps hit no row -> exact zero padding), so
    flat_out = flat_in @ T + b_tiled reproduces the conv exactly.
    """
    c_out, c_in, _, _ = w_oihw.shape
    h_out = (h_in - 1) // 2 + 1
    w_out = (w_in - 1) // 2 + 1
    sel_h = _tap_selector(h_in, h_out)          # (3, h_out, h_in), constant
    sel_w = _tap_selector(w_in, w_out)          # (3, w_out, w_in), constant
    t6 = jnp.einsum("xah,ybw,cixy->ihwcab", sel_h, sel_w,
                    w_oihw.astype(jnp.float32))
    t = t6.reshape(c_in * h_in * w_in, c_out * h_out * w_out)
    b_tiled = jnp.repeat(bias.astype(jnp.float32),
                         h_out * w_out).reshape(1, -1)
    return t, b_tiled, h_out, w_out


# ------------------------- parameter construction ---------------------------

def init_encoder_params(key, in_channels=1, latent_dim=8, n_filters=4,
                        patch_size=(16, 16)):
    """PyTorch-layout parameters (OIHW conv weights, (out,in) linear weight)."""
    n = 2 * 2 * 2 * 2
    hidden_dim = int(np.ceil(patch_size[0] / n) * np.ceil(patch_size[1] / n)
                     * n_filters * 8)
    chans = [in_channels, n_filters, 2 * n_filters, 4 * n_filters, 8 * n_filters]
    keys = jax.random.split(key, 10)
    convs = []
    for i in range(4):
        cin, cout = chans[i], chans[i + 1]
        w = 0.1 * jax.random.normal(keys[2 * i], (cout, cin, 3, 3), jnp.float32)
        b = 0.1 * jax.random.normal(keys[2 * i + 1], (cout,), jnp.float32)
        convs.append((w, b))
    w_lin = 0.1 * jax.random.normal(keys[8], (latent_dim, hidden_dim), jnp.float32)
    b_lin = 0.1 * jax.random.normal(keys[9], (latent_dim,), jnp.float32)
    return {"convs": convs, "linear": (w_lin, b_lin), "hidden_dim": hidden_dim}


def lower_encoder_params(params, patch_size=(16, 16)):
    """Weight-only preprocessing (done once): conv weights -> dense operators,
    biases tiled to NCHW flatten order, linear weight transposed."""
    h_cur, w_cur = patch_size
    ops = []
    for (w_conv, b_conv) in params["convs"]:
        t, bt, h_cur, w_cur = _conv_as_dense(w_conv, b_conv, h_cur, w_cur)
        ops += [t, bt]
    w_lin, b_lin = params["linear"]
    assert ops[-1].shape[1] == params["hidden_dim"] == w_lin.shape[1]
    ops += [jnp.transpose(w_lin).astype(jnp.float32),
            b_lin.reshape(1, -1).astype(jnp.float32)]
    return tuple(ops)


# ------------------------------ forward pass ---------------------------------

def _const_index_map(ndim):
    return lambda i, _n=ndim: (0,) * _n


def encoder_forward(lowered_params, x_nchw):
    """Single fused pallas_call; returns (None, None, None, z) like Encoder."""
    n = x_nchw.shape[0]
    x_flat = x_nchw.reshape(n, -1).astype(jnp.float32)   # NCHW flatten (free)
    operands = (x_flat,) + tuple(lowered_params)
    latent = lowered_params[-1].shape[-1]
    hidden = lowered_params[6].shape[1]

    # Advisory cost hint for XLA scheduling around the fused call.
    flops = 2 * n * sum(t.shape[0] * t.shape[1] for t in lowered_params[0:8:2])
    flops += 2 * n * lowered_params[8].shape[0] * latent
    bytes_accessed = 4 * (sum(int(np.prod(op.shape)) for op in operands)
                          + n * latent)
    cost = pl.CostEstimate(flops=int(flops), transcendentals=int(n * hidden),
                           bytes_accessed=int(bytes_accessed))

    z = pl.pallas_call(
        _encoder_kernel,
        out_shape=jax.ShapeDtypeStruct((n, latent), jnp.float32),
        grid=(1,),
        in_specs=[pl.BlockSpec(op.shape, _const_index_map(op.ndim))
                  for op in operands],
        out_specs=pl.BlockSpec((n, latent), lambda i: (0, 0)),
        compiler_params=pltpu.CompilerParams(
            dimension_semantics=("arbitrary",)),
        cost_estimate=cost,
    )(*operands)
    return (None, None, None, z)

# TODO(synk): type='VAE' branch (monai VarAutoEncoder) not implemented — the
# module under test is instantiated with type='AE'.


# ------------------------- pure-JAX reference (check) ------------------------

def encoder_reference(params, x_nchw):
    x = x_nchw.astype(jnp.float32)
    acts = ("relu", "relu", "relu", "tanh")
    hp = jax.lax.Precision.HIGHEST
    for (w, b), act in zip(params["convs"], acts):
        x = jax.lax.conv_general_dilated(
            x, w.astype(jnp.float32), window_strides=(2, 2),
            padding=((1, 1), (1, 1)),
            dimension_numbers=("NCHW", "OIHW", "NCHW"), precision=hp)
        x = x + b[None, :, None, None]
        x = jnp.maximum(x, 0.0) if act == "relu" else jnp.tanh(x)
    flat = x.reshape(x.shape[0], -1)                    # NCHW flatten
    w_lin, b_lin = params["linear"]
    return jnp.dot(flat, w_lin.T, precision=hp) + b_lin


if __name__ == "__main__":
    key = jax.random.PRNGKey(0)
    k_param, k_x = jax.random.split(key)
    # small shapes: batch=2, in_channels=1, patch=(16,16), n_filters=4, latent=8
    params = init_encoder_params(k_param, in_channels=1, latent_dim=8,
                                 n_filters=4, patch_size=(16, 16))
    lowered = lower_encoder_params(params, patch_size=(16, 16))
    x = jax.random.normal(k_x, (2, 1, 16, 16), jnp.float32)   # NCHW like PyTorch

    out = encoder_forward(lowered, x)
    z = out[3]
    jax.block_until_ready(z)
    assert z.shape == (2, 8) and z.dtype == jnp.float32

    z_ref = encoder_reference(params, x)
    max_err = float(jnp.max(jnp.abs(z - z_ref)))
    assert jnp.allclose(z, z_ref, atol=2e-2, rtol=2e-2), max_err
    print("KERNEL_OK")
</pallas_src>

<mosaic_0001>
module attributes {stable_mosaic.version = 11 : i64} {
  func.func @_encoder_kernel(%arg0: i32, %arg1: memref<2x256xf32, #tpu.memory_space<vmem>>, %arg2: memref<256x256xf32, #tpu.memory_space<vmem>>, %arg3: memref<1x256xf32, #tpu.memory_space<vmem>>, %arg4: memref<256x128xf32, #tpu.memory_space<vmem>>, %arg5: memref<1x128xf32, #tpu.memory_space<vmem>>, %arg6: memref<128x64xf32, #tpu.memory_space<vmem>>, %arg7: memref<1x64xf32, #tpu.memory_space<vmem>>, %arg8: memref<64x32xf32, #tpu.memory_space<vmem>>, %arg9: memref<1x32xf32, #tpu.memory_space<vmem>>, %arg10: memref<32x8xf32, #tpu.memory_space<vmem>>, %arg11: memref<1x8xf32, #tpu.memory_space<vmem>>, %arg12: memref<2x8xf32, #tpu.memory_space<vmem>>) attributes {dimension_semantics = [#tpu.dimension_semantics<arbitrary>], iteration_bounds = array<i64: 1>, scalar_prefetch = 0 : i64, scratch_operands = 0 : i64, tpu.core_type = #tpu.core_type<tc>, window_params = [{pipeline_mode = #tpu.pipeline_mode<synchronous>, transform_indices = @transform_0, window_bounds = array<i64: 2, 256>}, {pipeline_mode = #tpu.pipeline_mode<synchronous>, transform_indices = @transform_1, window_bounds = array<i64: 256, 256>}, {pipeline_mode = #tpu.pipeline_mode<synchronous>, transform_indices = @transform_2, window_bounds = array<i64: 1, 256>}, {pipeline_mode = #tpu.pipeline_mode<synchronous>, transform_indices = @transform_3, window_bounds = array<i64: 256, 128>}, {pipeline_mode = #tpu.pipeline_mode<synchronous>, transform_indices = @transform_4, window_bounds = array<i64: 1, 128>}, {pipeline_mode = #tpu.pipeline_mode<synchronous>, transform_indices = @transform_5, window_bounds = array<i64: 128, 64>}, {pipeline_mode = #tpu.pipeline_mode<synchronous>, transform_indices = @transform_6, window_bounds = array<i64: 1, 64>}, {pipeline_mode = #tpu.pipeline_mode<synchronous>, transform_indices = @transform_7, window_bounds = array<i64: 64, 32>}, {pipeline_mode = #tpu.pipeline_mode<synchronous>, transform_indices = @transform_8, window_bounds = array<i64: 1, 32>}, {pipeline_mode = #tpu.pipeline_mode<synchronous>, transform_indices = @transform_9, window_bounds = array<i64: 32, 8>}, {pipeline_mode = #tpu.pipeline_mode<synchronous>, transform_indices = @transform_10, window_bounds = array<i64: 1, 8>}, {pipeline_mode = #tpu.pipeline_mode<synchronous>, transform_indices = @transform_11, window_bounds = array<i64: 2, 8>}]} {
    %c0 = arith.constant 0 : index
    %c0_0 = arith.constant 0 : index
    %0 = vector.load %arg1[%c0, %c0_0] : memref<2x256xf32, #tpu.memory_space<vmem>>, vector<2x256xf32>
    %c0_1 = arith.constant 0 : index
    %c0_2 = arith.constant 0 : index
    %1 = vector.load %arg2[%c0_1, %c0_2] : memref<256x256xf32, #tpu.memory_space<vmem>>, vector<256x256xf32>
    %cst = arith.constant dense<0.000000e+00> : vector<2x256xf32>
    %2 = tpu.matmul %0, %1, %cst {dimension_numbers = #tpu.dot_dimension_numbers<[1], [0], [0], [1], [0, 0, 1, 1], [], []>} : vector<2x256xf32>, vector<256x256xf32>, vector<2x256xf32> -> vector<2x256xf32>
    %c0_3 = arith.constant 0 : index
    %c0_4 = arith.constant 0 : index
    %3 = vector.load %arg3[%c0_3, %c0_4] : memref<1x256xf32, #tpu.memory_space<vmem>>, vector<1x256xf32>
    %4 = vector.broadcast %3 : vector<1x256xf32> to vector<2x256xf32>
    %5 = arith.addf %2, %4 : vector<2x256xf32>
    %cst_5 = arith.constant 0.000000e+00 : f32
    %6 = vector.broadcast %cst_5 : f32 to vector<2x256xf32>
    %7 = arith.maximumf %5, %6 : vector<2x256xf32>
    %c0_6 = arith.constant 0 : index
    %c0_7 = arith.constant 0 : index
    %8 = vector.load %arg4[%c0_6, %c0_7] : memref<256x128xf32, #tpu.memory_space<vmem>>, vector<256x128xf32>
    %cst_8 = arith.constant dense<0.000000e+00> : vector<2x128xf32>
    %9 = tpu.matmul %7, %8, %cst_8 {dimension_numbers = #tpu.dot_dimension_numbers<[1], [0], [0], [1], [0, 0, 1, 1], [], []>} : vector<2x256xf32>, vector<256x128xf32>, vector<2x128xf32> -> vector<2x128xf32>
    %c0_9 = arith.constant 0 : index
    %c0_10 = arith.constant 0 : index
    %10 = vector.load %arg5[%c0_9, %c0_10] : memref<1x128xf32, #tpu.memory_space<vmem>>, vector<1x128xf32>
    %11 = vector.broadcast %10 : vector<1x128xf32> to vector<2x128xf32>
    %12 = arith.addf %9, %11 : vector<2x128xf32>
    %cst_11 = arith.constant 0.000000e+00 : f32
    %13 = vector.broadcast %cst_11 : f32 to vector<2x128xf32>
    %14 = arith.maximumf %12, %13 : vector<2x128xf32>
    %c0_12 = arith.constant 0 : index
    %c0_13 = arith.constant 0 : index
    %15 = vector.load %arg6[%c0_12, %c0_13] : memref<128x64xf32, #tpu.memory_space<vmem>>, vector<128x64xf32>
    %cst_14 = arith.constant dense<0.000000e+00> : vector<2x64xf32>
    %16 = tpu.matmul %14, %15, %cst_14 {dimension_numbers = #tpu.dot_dimension_numbers<[1], [0], [0], [1], [0, 0, 1, 1], [], []>} : vector<2x128xf32>, vector<128x64xf32>, vector<2x64xf32> -> vector<2x64xf32>
    %c0_15 = arith.constant 0 : index
    %c0_16 = arith.constant 0 : index
    %17 = vector.load %arg7[%c0_15, %c0_16] : memref<1x64xf32, #tpu.memory_space<vmem>>, vector<1x64xf32>
    %18 = vector.broadcast %17 : vector<1x64xf32> to vector<2x64xf32>
    %19 = arith.addf %16, %18 : vector<2x64xf32>
    %cst_17 = arith.constant 0.000000e+00 : f32
    %20 = vector.broadcast %cst_17 : f32 to vector<2x64xf32>
    %21 = arith.maximumf %19, %20 : vector<2x64xf32>
    %c0_18 = arith.constant 0 : index
    %c0_19 = arith.constant 0 : index
    %22 = vector.load %arg8[%c0_18, %c0_19] : memref<64x32xf32, #tpu.memory_space<vmem>>, vector<64x32xf32>
    %cst_20 = arith.constant dense<0.000000e+00> : vector<2x32xf32>
    %23 = tpu.matmul %21, %22, %cst_20 {dimension_numbers = #tpu.dot_dimension_numbers<[1], [0], [0], [1], [0, 0, 1, 1], [], []>} : vector<2x64xf32>, vector<64x32xf32>, vector<2x32xf32> -> vector<2x32xf32>
    %c0_21 = arith.constant 0 : index
    %c0_22 = arith.constant 0 : index
    %24 = vector.load %arg9[%c0_21, %c0_22] : memref<1x32xf32, #tpu.memory_space<vmem>>, vector<1x32xf32>
    %25 = vector.broadcast %24 : vector<1x32xf32> to vector<2x32xf32>
    %26 = arith.addf %23, %25 : vector<2x32xf32>
    %27 = math.tanh %26 : vector<2x32xf32>
    %c0_23 = arith.constant 0 : index
    %c0_24 = arith.constant 0 : index
    %28 = vector.load %arg10[%c0_23, %c0_24] : memref<32x8xf32, #tpu.memory_space<vmem>>, vector<32x8xf32>
    %cst_25 = arith.constant dense<0.000000e+00> : vector<2x8xf32>
    %29 = tpu.matmul %27, %28, %cst_25 {dimension_numbers = #tpu.dot_dimension_numbers<[1], [0], [0], [1], [0, 0, 1, 1], [], []>} : vector<2x32xf32>, vector<32x8xf32>, vector<2x8xf32> -> vector<2x8xf32>
    %c0_26 = arith.constant 0 : index
    %c0_27 = arith.constant 0 : index
    %30 = vector.load %arg11[%c0_26, %c0_27] : memref<1x8xf32, #tpu.memory_space<vmem>>, vector<1x8xf32>
    %31 = vector.broadcast %30 : vector<1x8xf32> to vector<2x8xf32>
    %32 = arith.addf %29, %31 : vector<2x8xf32>
    %c0_28 = arith.constant 0 : index
    %c0_29 = arith.constant 0 : index
    %33 = vector.load %arg12[%c0_28, %c0_29] : memref<2x8xf32, #tpu.memory_space<vmem>>, vector<2x8xf32>
    tpu.vector_store %arg12[%c0_28, %c0_29], %32 {strides = array<i32>} : memref<2x8xf32, #tpu.memory_space<vmem>>, vector<2x8xf32>,
    return
  }
  func.func @transform_0(%arg0: i32) -> (i32, i32) {
    %c0_i32 = arith.constant 0 : i32
    %c0_i32_0 = arith.constant 0 : i32
    %c0_i32_1 = arith.constant 0 : i32
    return %c0_i32, %c0_i32_0 : i32, i32
  }
  func.func @transform_1(%arg0: i32) -> (i32, i32) {
    %c0_i32 = arith.constant 0 : i32
    %c0_i32_0 = arith.constant 0 : i32
    %c0_i32_1 = arith.constant 0 : i32
    return %c0_i32, %c0_i32_0 : i32, i32
  }
  func.func @transform_2(%arg0: i32) -> (i32, i32) {
    %c0_i32 = arith.constant 0 : i32
    %c0_i32_0 = arith.constant 0 : i32
    %c0_i32_1 = arith.constant 0 : i32
    return %c0_i32, %c0_i32_0 : i32, i32
  }
  func.func @transform_3(%arg0: i32) -> (i32, i32) {
    %c0_i32 = arith.constant 0 : i32
    %c0_i32_0 = arith.constant 0 : i32
    %c0_i32_1 = arith.constant 0 : i32
    return %c0_i32, %c0_i32_0 : i32, i32
  }
  func.func @transform_4(%arg0: i32) -> (i32, i32) {
    %c0_i32 = arith.constant 0 : i32
    %c0_i32_0 = arith.constant 0 : i32
    %c0_i32_1 = arith.constant 0 : i32
    return %c0_i32, %c0_i32_0 : i32, i32
  }
  func.func @transform_5(%arg0: i32) -> (i32, i32) {
    %c0_i32 = arith.constant 0 : i32
    %c0_i32_0 = arith.constant 0 : i32
    %c0_i32_1 = arith.constant 0 : i32
    return %c0_i32, %c0_i32_0 : i32, i32
  }
  func.func @transform_6(%arg0: i32) -> (i32, i32) {
    %c0_i32 = arith.constant 0 : i32
    %c0_i32_0 = arith.constant 0 : i32
    %c0_i32_1 = arith.constant 0 : i32
    return %c0_i32, %c0_i32_0 : i32, i32
  }
  func.func @transform_7(%arg0: i32) -> (i32, i32) {
    %c0_i32 = arith.constant 0 : i32
    %c0_i32_0 = arith.constant 0 : i32
    %c0_i32_1 = arith.constant 0 : i32
    return %c0_i32, %c0_i32_0 : i32, i32
  }
  func.func @transform_8(%arg0: i32) -> (i32, i32) {
    %c0_i32 = arith.constant 0 : i32
    %c0_i32_0 = arith.constant 0 : i32
    %c0_i32_1 = arith.constant 0 : i32
    return %c0_i32, %c0_i32_0 : i32, i32
  }
  func.func @transform_9(%arg0: i32) -> (i32, i32) {
    %c0_i32 = arith.constant 0 : i32
    %c0_i32_0 = arith.constant 0 : i32
    %c0_i32_1 = arith.constant 0 : i32
    return %c0_i32, %c0_i32_0 : i32, i32
  }
  func.func @transform_10(%arg0: i32) -> (i32, i32) {
    %c0_i32 = arith.constant 0 : i32
    %c0_i32_0 = arith.constant 0 : i32
    %c0_i32_1 = arith.constant 0 : i32
    return %c0_i32, %c0_i32_0 : i32, i32
  }
  func.func @transform_11(%arg0: i32) -> (i32, i32) {
    %c0_i32 = arith.constant 0 : i32
    %c0_i32_0 = arith.constant 0 : i32
    %c0_i32_1 = arith.constant 0 : i32
    return %c0_i32, %c0_i32_0 : i32, i32
  }
}

</mosaic_0001>

<bundles_post_ra>
// kernel: tpu_custom_call.1
= control target key start
LH: loop header
LB: loop body
LE: loop exit
PB: predicated region body
PF: predicated region fallthrough
CT: control target
= control target key end

     0   :  { %16 = vsyncpa [#allocation3], 0  ;;  %s1438_s0 = inlined_call_operand.hbm [shape: f32[2,256], index: 0, kind: input, shape index: {}]   ;;  %s1439_s1 = inlined_call_operand.hbm [shape: f32[256,256], index: 1, kind: input, shape index: {}]   ;;  %s1440_s2 = inlined_call_operand.vmem [shape: f32[1,256], index: 2, kind: input, shape index: {}]   ;;  %s1441_s3 = inlined_call_operand.vmem [shape: f32[256,128], index: 3, kind: input, shape index: {}]   ;;  %s1442_s4 = inlined_call_operand.hbm [shape: f32[1,128], index: 4, kind: input, shape index: {}]   ;;  %s1443_s5 = inlined_call_operand.vmem [shape: f32[128,64], index: 5, kind: input, shape index: {}]   ;;  %s1444_s6 = inlined_call_operand.hbm [shape: f32[1,64], index: 6, kind: input, shape index: {}]   ;;  %s1445_s7 = inlined_call_operand.vmem [shape: f32[64,32], index: 7, kind: input, shape index: {}]   ;;  %s1446_s8 = inlined_call_operand.hbm [shape: f32[1,32], index: 8, kind: input, shape index: {}]   ;;  %s1447_s9 = inlined_call_operand.vmem [shape: f32[32,8], index: 9, kind: input, shape index: {}]   ;;  %s1448_s10 = inlined_call_operand.vmem [shape: f32[1,8], index: 10, kind: input, shape index: {}]   ;;  %s1449_s11 = inlined_call_operand.hbm [shape: f32[2,8], index: 11, kind: output, shape index: {}]  }
   0x1   :  { %17 = vsyncpa [#allocation6], 0 }
   0x2   :  { %18 = vsyncpa [#allocation9], 0 }
   0x3   :  { %19 = vsyncpa [#allocation4], 0  ;;  %s1087_s17 = smov [#allocation5]   ;;  %s947_s21 = scalar_lea.hbm %s1439_s1, 8192 }
   0x4   :  { %s35_s18 = sshll.u32 %s1087_s17, 4  ;;  %p948_p0 = scmp.ne.s32.totalorder %s1439_s1, %s947_s21  ;;  %s36_s18 = int_to_ptr.vmem [resolvable:$true] %s35_s18 }
   0x5   :  { %p951_p1 = scmp.lt.u32.totalorder %s947_s21, %s1439_s1 }
   0x7   :  { %p953_p2 = pnand %p951_p1, %p948_p0 }
   0x9   :  { %956 = shalt.err (!%p953_p2)
}
   0xa   :  { %s957_s26 = scalar_lea.vmem %s36_s18, 8192  ;;  %p962_p4 = scmp.lt.s32.totalorder %s36_s18, %s36_s18 }
   0xb   :  { %p958_p3 = scmp.ne.s32.totalorder %s36_s18, %s957_s26  ;;  %p963_p5 = scmp.lt.s32.totalorder %s957_s26, %s957_s26 }
   0xd   :  { %p964_p6 = por %p963_p5, %p962_p4 }
   0xf   :  { %p965_p7 = pnand %p964_p6, %p958_p3 }
  0x11   :  { %968 = shalt.err (!%p965_p7)
}
  0x12   :  { %s1088_s27 = smov 256   ;;  %s1089_s28 = smov 16  }
  0x13   :  { %41 = dma.hbm_to_vmem [thread:$0]  %s1439_s1, 8192, %s36_s18, [#allocation6], %s1088_s27, %s1088_s27, %s1089_s28  }
  0x14   :  { %s1090_s12 = smov [#allocation8]   ;;  %s1091_s14 = smov [#allocation2]  }
  0x15   :  { %s64_s13 = sshll.u32 %s1090_s12, 4  ;;  %s26_s15 = sshll.u32 %s1091_s14, 4  ;;  %s65_s13 = int_to_ptr.vmem [resolvable:$true] %s64_s13  ;;  %s27_s15 = int_to_ptr.vmem [resolvable:$true] %s26_s15 }
  0x16   :  { %s969_s19 = scalar_lea.hbm %s1444_s6, 16 }
  0x17   :  { %p970_p8 = scmp.ne.s32.totalorder %s1444_s6, %s969_s19  ;;  %p973_p9 = scmp.lt.u32.totalorder %s969_s19, %s1444_s6 }
  0x19   :  { %p975_p10 = pnand %p973_p9, %p970_p8 }
  0x1b   :  { %978 = shalt.err (!%p975_p10)
}
  0x1c   :  { %s979_s1 = scalar_lea.vmem %s65_s13, 16  ;;  %s983_s18 = scalar_lea.vmem %s65_s13, 32 }
  0x1d   :  { %p980_p11 = scmp.ne.s32.totalorder %s65_s13, %s979_s1  ;;  %p984_p12 = scmp.lt.s32.totalorder %s65_s13, %s65_s13 }
  0x1e   :  { %p985_p13 = scmp.lt.s32.totalorder %s983_s18, %s979_s1 }
  0x20   :  { %p986_p0 = por %p985_p13, %p984_p12 }
  0x22   :  { %p987_p1 = pnand %p986_p0, %p980_p11 }
  0x24   :  { %990 = shalt.err (!%p987_p1)
}
  0x25   :  { %67 = dma.hbm_to_vmem [thread:$0]  %s1444_s6, 16, %s65_s13, [#allocation9]  }
  0x26   :  { %s991_s28 = scalar_lea.hbm %s1438_s0, 64 }
  0x27   :  { %p992_p2 = scmp.ne.s32.totalorder %s1438_s0, %s991_s28  ;;  %p995_p3 = scmp.lt.u32.totalorder %s991_s28, %s1438_s0 }
  0x29   :  { %p997_p4 = pnand %p995_p3, %p992_p2 }
  0x2b   :  { %1000 = shalt.err (!%p997_p4)
}
  0x2c   :  { %s1001_s16 = scalar_lea.vmem %s27_s15, 64  ;;  %p1006_p6 = scmp.lt.s32.totalorder %s27_s15, %s27_s15 }
  0x2d   :  { %p1002_p5 = scmp.ne.s32.totalorder %s27_s15, %s1001_s16  ;;  %p1007_p7 = scmp.lt.s32.totalorder %s1001_s16, %s1001_s16 }
  0x2f   :  { %p1008_p8 = por %p1007_p7, %p1006_p6 }
  0x31   :  { %p1009_p9 = pnand %p1008_p8, %p1002_p5 }
  0x33   :  { %1012 = shalt.err (!%p1009_p9)
}
  0x34   :  { %29 = dma.hbm_to_vmem [thread:$0]  %s1438_s0, 64, %s27_s15, [#allocation3]  }
  0x35   :  { %s1092_s17 = smov [#allocation7]   ;;  %s1093_s20 = smov [#allocation10]  }
  0x36   :  { %s52_s19 = sshll.u32 %s1092_s17, 4  ;;  %s76_s21 = sshll.u32 %s1093_s20, 4  ;;  %s53_s19 = int_to_ptr.vmem [resolvable:$true] %s52_s19  ;;  %s77_s21 = int_to_ptr.vmem [resolvable:$true] %s76_s21 }
  0x37   :  { %s1013_s1 = scalar_lea.hbm %s1442_s4, 16 }
  0x38   :  { %p1014_p10 = scmp.ne.s32.totalorder %s1442_s4, %s1013_s1  ;;  %p1017_p11 = scmp.lt.u32.totalorder %s1013_s1, %s1442_s4 }
  0x3a   :  { %p1019_p12 = pnand %p1017_p11, %p1014_p10 }
  0x3c   :  { %1022 = shalt.err (!%p1019_p12)
}
  0x3d   :  { %s1023_s0 = scalar_lea.vmem %s53_s19, 16  ;;  %s1027_s15 = scalar_lea.vmem %s53_s19, 32 }
  0x3e   :  { %p1024_p13 = scmp.ne.s32.totalorder %s53_s19, %s1023_s0  ;;  %p1028_p0 = scmp.lt.s32.totalorder %s53_s19, %s53_s19 }
  0x3f   :  { %p1029_p1 = scmp.lt.s32.totalorder %s1027_s15, %s1023_s0 }
  0x41   :  { %p1030_p2 = por %p1029_p1, %p1028_p0 }
  0x43   :  { %p1031_p3 = pnand %p1030_p2, %p1024_p13 }
  0x45   :  { %1034 = shalt.err (!%p1031_p3)
}
  0x46   :  { %55 = dma.hbm_to_vmem [thread:$0]  %s1442_s4, 16, %s53_s19, [#allocation6]  }
  0x47   :  { %s1035_s12 = scalar_lea.hbm %s1446_s8, 16 }
  0x48   :  { %p1036_p4 = scmp.ne.s32.totalorder %s1446_s8, %s1035_s12  ;;  %p1039_p5 = scmp.lt.u32.totalorder %s1035_s12, %s1446_s8 }
  0x4a   :  { %p1041_p6 = pnand %p1039_p5, %p1036_p4 }
  0x4c   :  { %1044 = shalt.err (!%p1041_p6)
}
  0x4d   :  { %s1045_s17 = scalar_lea.vmem %s77_s21, 16  ;;  %s1049_s20 = scalar_lea.vmem %s77_s21, 32 }
  0x4e   :  { %p1046_p7 = scmp.ne.s32.totalorder %s77_s21, %s1045_s17  ;;  %p1050_p8 = scmp.lt.s32.totalorder %s77_s21, %s77_s21 }
  0x4f   :  { %p1051_p9 = scmp.lt.s32.totalorder %s1049_s20, %s1045_s17 }
  0x51   :  { %p1052_p10 = por %p1051_p9, %p1050_p8 }
  0x53   :  { %p1053_p11 = pnand %p1052_p10, %p1046_p7 }
  0x55   :  { %1056 = shalt.err (!%p1053_p11)
}
  0x56   :  { %79 = dma.hbm_to_vmem [thread:$0]  %s1446_s8, 16, %s77_s21, [#allocation9]  }
  0x57   :  { %1079 = dma.done.wait [#allocation3], 64  }
  0x58   :  { %1080 = vsyncadd [#allocation3], 4294967232 }
  0x59   :  { %1081 = dma.done.wait [#allocation6], 8208  }
  0x5a   :  { %1082 = vsyncadd [#allocation6], 4294959088 }
  0x5b   :  { %1083 = dma.done.wait [#allocation9], 32  }
  0x5c   :  { %1084 = vsyncadd [#allocation9], 4294967264  ;;  %v101_v0 = vld [vmem:[#allocation5 + $0x8] sm:$0xff]  ;;  %v103_v1 = vld [vmem:[#allocation5 + $0x18] sm:$0xff]  ;;  %vm1095_vm0 = vmmov 0   ;;  %vm479_vm1 = vcmask 523264  }
  0x5d   :  { %v100_v2 = vld [vmem:[#allocation5] sm:$0xff]  ;;  %v796_v3 = vpack.c.bf16 %v103_v1, %v101_v0  ;;  %v102_v4 = vld [vmem:[#allocation5 + $0x10] sm:$0xff]  ;;  %v105_v5 = vld [vmem:[#allocation5 + $0x28] sm:$0xff]  ;;  %vm565_vm2 = vcmask 261120   ;;  %s1097_s20 = smov [#allocation11]   ;;  %vm639_vm3 = vcmask 58368  }
  0x5e   :  { %v107_v6 = vld [vmem:[#allocation5 + $0x38] sm:$0xff]  ;;  %v798_v7 = vpack.c.bf16 %v102_v4, %v100_v2  ;;  %v104_v9 = vld [vmem:[#allocation5 + $0x20] sm:$0xff]  ;;  %v106_v10 = vld [vmem:[#allocation5 + $0x30] sm:$0xff] }
  0x5f   :  { %v800_v8 = vpack.c.bf16 %v107_v6, %v105_v5  ;;  %v109_v11 = vld [vmem:[#allocation5 + $0x48] sm:$0xff]  ;;  %797 = vmatprep.subr.bf16.mxu0 %v796_v3  ;;  %v111_v12 = vld [vmem:[#allocation5 + $0x58] sm:$0xff]  ;;  %v802_v13 = vpack.c.bf16 %v106_v10, %v104_v9  ;;  %v108_v15 = vld [vmem:[#allocation5 + $0x40] sm:$0xff] }
  0x60   :  { %799 = vmatpush1.bf16.msra.mxu0 %v798_v7  ;;  %v804_v14 = vpack.c.bf16 %v111_v12, %v109_v11  ;;  %v110_v16 = vld [vmem:[#allocation5 + $0x50] sm:$0xff]  ;;  %v113_v17 = vld [vmem:[#allocation5 + $0x68] sm:$0xff]  ;;  %v115_v18 = vld [vmem:[#allocation5 + $0x78] sm:$0xff] }
  0x61   :  { %801 = vmatprep.subr.bf16.mxu0 %v800_v8  ;;  %v806_v19 = vpack.c.bf16 %v110_v16, %v108_v15  ;;  %v808_v20 = vpack.c.bf16 %v115_v18, %v113_v17  ;;  %v112_v21 = vld [vmem:[#allocation5 + $0x60] sm:$0xff]  ;;  %v114_v22 = vld [vmem:[#allocation5 + $0x70] sm:$0xff]  ;;  %v117_v23 = vld [vmem:[#allocation5 + $0x88] sm:$0xff] }
  0x62   :  { %v119_v24 = vld [vmem:[#allocation5 + $0x98] sm:$0xff]  ;;  %v810_v25 = vpack.c.bf16 %v114_v22, %v112_v21  ;;  %v116_v27 = vld [vmem:[#allocation5 + $0x80] sm:$0xff]  ;;  %v118_v28 = vld [vmem:[#allocation5 + $0x90] sm:$0xff] }
  0x63   :  { %v812_v26 = vpack.c.bf16 %v119_v24, %v117_v23  ;;  %v121_v29 = vld [vmem:[#allocation5 + $0xa8] sm:$0xff]  ;;  %v123_v30 = vld [vmem:[#allocation5 + $0xb8] sm:$0xff]  ;;  %v814_v31 = vpack.c.bf16 %v118_v28, %v116_v27  ;;  %v120_v33 = vld [vmem:[#allocation5 + $0xa0] sm:$0xff] }
  0x64   :  { %803 = vmatpush1.bf16.msra.mxu0 %v802_v13  ;;  %v816_v32 = vpack.c.bf16 %v123_v30, %v121_v29  ;;  %v122_v34 = vld [vmem:[#allocation5 + $0xb0] sm:$0xff]  ;;  %v125_v35 = vld [vmem:[#allocation5 + $0xc8] sm:$0xff]  ;;  %v127_v36 = vld [vmem:[#allocation5 + $0xd8] sm:$0xff] }
  0x65   :  { %805 = vmatprep.subr.bf16.mxu0 %v804_v14  ;;  %v818_v37 = vpack.c.bf16 %v122_v34, %v120_v33  ;;  %v124_v38 = vld [vmem:[#allocation5 + $0xc0] sm:$0xff]  ;;  %v126_v39 = vld [vmem:[#allocation5 + $0xd0] sm:$0xff]  ;;  %v129_v40 = vld [vmem:[#allocation5 + $0xe8] sm:$0xff]  ;;  %v820_v41 = vpack.c.bf16 %v127_v36, %v125_v35 }
  0x66   :  { %v131_v42 = vld [vmem:[#allocation5 + $0xf8] sm:$0xff]  ;;  %v277_v46 = vld [vmem:[%s1441_s3 + $0x88] sm:$0xff]  ;;  %v278_v51 = vld [vmem:[%s1441_s3 + $0x90] sm:$0xff]  ;;  %v822_v54 = vpack.c.bf16 %v126_v39, %v124_v38 }
  0x67   :  { %v1218_v43 = vld.sshfl [vmem:[#allocation2] sm:$0x33 pattern:$0x76325410]  ;;  %v261_v48 = vld [vmem:[%s1441_s3 + $0x8] sm:$0xff]  ;;  %v279_v52 = vld [vmem:[%s1441_s3 + $0x98] sm:$0xff]  ;;  %v824_v59 = vpack.c.bf16 %v131_v42, %v129_v40 }
  0x68   :  { %807 = vmatpush1.bf16.msra.mxu0 %v806_v19  ;;  %v276_v44 = vld [vmem:[%s1441_s3 + $0x80] sm:$0xff]  ;;  %v184_v45 = vcombine.high %v1218_v43, %v1218_v43  ;;  %v262_v53 = vld [vmem:[%s1441_s3 + $0x10] sm:$0xff]  ;;  %v864_v55 = vpack.c.bf16 %v279_v52, %v278_v51  ;;  %v263_v56 = vld [vmem:[%s1441_s3 + $0x18] sm:$0xff] }
  0x69   :  { %809 = vmatprep.subr.bf16.mxu0 %v808_v20  ;;  %v260_v47 = vld [vmem:[%s1441_s3] sm:$0xff]  ;;  %v860_v49 = vpack.c.bf16 %v277_v46, %v276_v44  ;;  %v281_v58 = vld [vmem:[%s1441_s3 + $0xa8] sm:$0xff]  ;;  %v130_v61 = vld [vmem:[#allocation5 + $0xf0] sm:$0xff]  ;;  %v866_v0 = vpack.c.bf16 %v263_v56, %v262_v53 }
  0x6a   :  { %v862_v50 = vpack.c.bf16 %v261_v48, %v260_v47  ;;  %251 = vmatprep.mubr.f32.mxu0 %v184_v45  ;;  %v280_v57 = vld [vmem:[%s1441_s3 + $0xa0] sm:$0xff]  ;;  %v133_v62 = vld [vmem:[#allocation5 + $0x108] sm:$0xff]  ;;  %v283_v6 = vld [vmem:[%s1441_s3 + $0xb8] sm:$0xff] }
  0x6b   :  { %v128_v60 = vld [vmem:[#allocation5 + $0xe0] sm:$0xff]  ;;  %861 = vmatprep.subr.bf16.mxu1 %v860_v49  ;;  %v135_v63 = vld [vmem:[#allocation5 + $0x118] sm:$0xff]  ;;  %v868_v1 = vpack.c.bf16 %v281_v58, %v280_v57  ;;  %v282_v5 = vld [vmem:[%s1441_s3 + $0xb0] sm:$0xff] }
  0x6c   :  { %811 = vmatpush1.bf16.msra.mxu0 %v810_v25  ;;  %863 = vmatpush3.bf16.msra.mxu1 %v862_v50  ;;  %v264_v2 = vld [vmem:[%s1441_s3 + $0x20] sm:$0xff]  ;;  %v265_v3 = vld [vmem:[%s1441_s3 + $0x28] sm:$0xff]  ;;  %v826_v4 = vpack.c.bf16 %v130_v61, %v128_v60  ;;  %v828_v7 = vpack.c.bf16 %v135_v63, %v133_v62  ;;  %v134_v9 = vld [vmem:[#allocation5 + $0x110] sm:$0xff]  ;;  %v872_v13 = vpack.c.bf16 %v283_v6, %v282_v5 }
  0x6d   :  { %813 = vmatprep.subr.bf16.mxu0 %v812_v26  ;;  %865 = vmatprep.subr.bf16.mxu1 %v864_v55  ;;  %v132_v8 = vld [vmem:[#allocation5 + $0x100] sm:$0xff]  ;;  %v137_v10 = vld [vmem:[#allocation5 + $0x128] sm:$0xff]  ;;  %v139_v11 = vld [vmem:[#allocation5 + $0x138] sm:$0xff]  ;;  %v870_v12 = vpack.c.bf16 %v265_v3, %v264_v2 }
  0x6e   :  { %v266_v14 = vld [vmem:[%s1441_s3 + $0x30] sm:$0xff]  ;;  %v267_v15 = vld [vmem:[%s1441_s3 + $0x38] sm:$0xff]  ;;  %v830_v16 = vpack.c.bf16 %v134_v9, %v132_v8  ;;  %v284_v17 = vld [vmem:[%s1441_s3 + $0xc0] sm:$0xff]  ;;  %v832_v19 = vpack.c.bf16 %v139_v11, %v137_v10 }
  0x6f   :  { %v285_v18 = vld [vmem:[%s1441_s3 + $0xc8] sm:$0xff]  ;;  %v138_v21 = vld [vmem:[#allocation5 + $0x130] sm:$0xff]  ;;  %v143_v23 = vld [vmem:[#allocation5 + $0x158] sm:$0xff]  ;;  %v874_v24 = vpack.c.bf16 %v267_v15, %v266_v14 }
  0x70   :  { %815 = vmatpush1.bf16.msra.mxu0 %v814_v31  ;;  %867 = vmatpush3.bf16.msra.mxu1 %v866_v0  ;;  %v136_v20 = vld [vmem:[#allocation5 + $0x120] sm:$0xff]  ;;  %v141_v22 = vld [vmem:[#allocation5 + $0x148] sm:$0xff]  ;;  %v876_v25 = vpack.c.bf16 %v285_v18, %v284_v17  ;;  %v287_v30 = vld [vmem:[%s1441_s3 + $0xd8] sm:$0xff]  ;;  %v1094_v18 = vmov 0.0|0.0  }
  0x71   :  { %817 = vmatprep.subr.bf16.mxu0 %v816_v32  ;;  %869 = vmatprep.subr.bf16.mxu1 %v868_v1  ;;  %v268_v26 = vld [vmem:[%s1441_s3 + $0x40] sm:$0xff]  ;;  %v269_v27 = vld [vmem:[%s1441_s3 + $0x48] sm:$0xff]  ;;  %v834_v28 = vpack.c.bf16 %v138_v21, %v136_v20  ;;  %v286_v29 = vld [vmem:[%s1441_s3 + $0xd0] sm:$0xff]  ;;  %v836_v31 = vpack.c.bf16 %v143_v23, %v141_v22 }
  0x72   :  { %v140_v32 = vld [vmem:[#allocation5 + $0x140] sm:$0xff]  ;;  %v142_v33 = vld [vmem:[#allocation5 + $0x150] sm:$0xff]  ;;  %v145_v34 = vld [vmem:[#allocation5 + $0x168] sm:$0xff]  ;;  %v878_v36 = vpack.c.bf16 %v269_v27, %v268_v26 }
  0x73   :  { %v147_v35 = vld [vmem:[#allocation5 + $0x178] sm:$0xff]  ;;  %v270_v38 = vld [vmem:[%s1441_s3 + $0x50] sm:$0xff]  ;;  %v838_v40 = vpack.c.bf16 %v142_v33, %v140_v32  ;;  %v289_v42 = vld [vmem:[%s1441_s3 + $0xe8] sm:$0xff] }
  0x74   :  { %819 = vmatpush1.bf16.msra.mxu0 %v818_v37  ;;  %871 = vmatpush3.bf16.msra.mxu1 %v870_v12  ;;  %v880_v37 = vpack.c.bf16 %v287_v30, %v286_v29  ;;  %v271_v39 = vld [vmem:[%s1441_s3 + $0x58] sm:$0xff]  ;;  %v840_v44 = vpack.c.bf16 %v147_v35, %v145_v34  ;;  %v144_v45 = vld [vmem:[#allocation5 + $0x160] sm:$0xff]  ;;  %v149_v47 = vld [vmem:[#allocation5 + $0x188] sm:$0xff] }
  0x75   :  { %821 = vmatprep.subr.bf16.mxu0 %v820_v41  ;;  %873 = vmatprep.subr.bf16.mxu1 %v872_v13  ;;  %v288_v41 = vld [vmem:[%s1441_s3 + $0xe0] sm:$0xff]  ;;  %v146_v46 = vld [vmem:[#allocation5 + $0x170] sm:$0xff]  ;;  %v882_v49 = vpack.c.bf16 %v271_v39, %v270_v38  ;;  %v153_v55 = vld [vmem:[#allocation5 + $0x1a8] sm:$0xff] }
  0x76   :  { %v151_v48 = vld [vmem:[#allocation5 + $0x198] sm:$0xff]  ;;  %v884_v50 = vpack.c.bf16 %v289_v42, %v288_v41  ;;  %v842_v51 = vpack.c.bf16 %v146_v46, %v144_v45  ;;  %v148_v53 = vld [vmem:[#allocation5 + $0x180] sm:$0xff]  ;;  %v154_v60 = vld [vmem:[#allocation5 + $0x1b0] sm:$0xff] }
  0x77   :  { %v844_v52 = vpack.c.bf16 %v151_v48, %v149_v47  ;;  %v155_v56 = vld [vmem:[#allocation5 + $0x1b8] sm:$0xff]  ;;  %v157_v61 = vld [vmem:[#allocation5 + $0x1c8] sm:$0xff]  ;;  %v156_v1 = vld [vmem:[#allocation5 + $0x1c0] sm:$0xff] }
  0x78   :  { %823 = vmatpush1.bf16.msra.mxu0 %v822_v54  ;;  %875 = vmatpush3.bf16.msra.mxu1 %v874_v24  ;;  %v150_v54 = vld [vmem:[#allocation5 + $0x190] sm:$0xff]  ;;  %v848_v58 = vpack.c.bf16 %v155_v56, %v153_v55  ;;  %v159_v62 = vld [vmem:[#allocation5 + $0x1d8] sm:$0xff]  ;;  %v161_v3 = vld [vmem:[#allocation5 + $0x1e8] sm:$0xff] }
  0x79   :  { %825 = vmatprep.subr.bf16.mxu0 %v824_v59  ;;  %877 = vmatprep.subr.bf16.mxu1 %v876_v25  ;;  %v846_v57 = vpack.c.bf16 %v150_v54, %v148_v53  ;;  %v152_v59 = vld [vmem:[#allocation5 + $0x1a0] sm:$0xff]  ;;  %v852_v0 = vpack.c.bf16 %v159_v62, %v157_v61  ;;  %v158_v2 = vld [vmem:[#allocation5 + $0x1d0] sm:$0xff]  ;;  %v164_v22 = vld [vmem:[%s1440_s2] sm:$0x3]  ;;  %s647_s2 = sshll.u32 %s1097_s20, 4  ;;  %s648_s2 = int_to_ptr.vmem [resolvable:$true] %s647_s2 }
  0x7a   :  { %v850_v63 = vpack.c.bf16 %v154_v60, %v152_v59  ;;  %v854_v5 = vpack.c.bf16 %v158_v2, %v156_v1  ;;  %v162_v8 = vld [vmem:[#allocation5 + $0x1f0] sm:$0xff]  ;;  %v272_v10 = vld [vmem:[%s1441_s3 + $0x60] sm:$0xff]  ;;  %v273_v11 = vld [vmem:[%s1441_s3 + $0x68] sm:$0xff]  ;;  %p1062_p13 = scmp.lt.s32.totalorder %s648_s2, %s648_s2 }
  0x7b   :  { %v886_v12 = vpack.c.bf16 %v273_v11, %v272_v10  ;;  %v290_v13 = vld [vmem:[%s1441_s3 + $0xf0] sm:$0xff]  ;;  %v291_v14 = vld [vmem:[%s1441_s3 + $0xf8] sm:$0xff]  ;;  %v370_v29 = vld [vmem:[%s1443_s5] sm:$0xff] }
  0x7c   :  { %827 = vmatpush1.bf16.msra.mxu0 %v826_v4  ;;  %879 = vmatpush3.bf16.msra.mxu1 %v878_v36  ;;  %v163_v4 = vld [vmem:[#allocation5 + $0x1f8] sm:$0xff]  ;;  %v888_v15 = vpack.c.bf16 %v291_v14, %v290_v13  ;;  %v371_v30 = vld [vmem:[%s1443_s5 + $0x8] sm:$0xff]  ;;  %v372_v35 = vld [vmem:[%s1443_s5 + $0x10] sm:$0xff] }
  0x7d   :  { %829 = vmatprep.subr.bf16.mxu0 %v828_v7  ;;  %881 = vmatprep.subr.bf16.mxu1 %v880_v37  ;;  %v856_v6 = vpack.c.bf16 %v163_v4, %v161_v3  ;;  %v160_v7 = vld [vmem:[#allocation5 + $0x1e0] sm:$0xff]  ;;  %v893_v33 = vpack.c.bf16 %v371_v30, %v370_v29  ;;  %v373_v36 = vld [vmem:[%s1443_s5 + $0x18] sm:$0xff]  ;;  %v376_v41 = vld [vmem:[%s1443_s5 + $0x30] sm:$0xff] }
  0x7e   :  { %v858_v9 = vpack.c.bf16 %v162_v8, %v160_v7  ;;  %v896_v37 = vpack.c.bf16 %v373_v36, %v372_v35  ;;  %v374_v38 = vld [vmem:[%s1443_s5 + $0x20] sm:$0xff]  ;;  %v375_v39 = vld [vmem:[%s1443_s5 + $0x28] sm:$0xff]  ;;  %v377_v42 = vld [vmem:[%s1443_s5 + $0x38] sm:$0xff] }
  0x7f   :  { %v378_v45 = vld [vmem:[%s1443_s5 + $0x40] sm:$0xff]  ;;  %v379_v46 = vld [vmem:[%s1443_s5 + $0x48] sm:$0xff]  ;;  %v380_v48 = vld [vmem:[%s1443_s5 + $0x50] sm:$0xff] }
  0x80   :  { %831 = vmatpush1.bf16.msra.mxu0 %v830_v16  ;;  %883 = vmatpush3.bf16.msra.mxu1 %v882_v49  ;;  %v275_v16 = vld [vmem:[%s1441_s3 + $0x78] sm:$0xff]  ;;  %v905_v47 = vpack.c.bf16 %v379_v46, %v378_v45  ;;  %v384_v54 = vld [vmem:[%s1443_s5 + $0x70] sm:$0xff]  ;;  %v465_v59 = vld [vmem:[%s1445_s7 + $0x8] sm:$0xff] }
  0x81   :  { %833 = vmatprep.subr.bf16.mxu0 %v832_v19  ;;  %885 = vmatprep.subr.bf16.mxu1 %v884_v50  ;;  %v166_v19 = vlaneseq  ;;  %v381_v49 = vld [vmem:[%s1443_s5 + $0x58] sm:$0xff]  ;;  %v466_v60 = vld [vmem:[%s1445_s7 + $0x10] sm:$0xff]  ;;  %v469_v1 = vld [vmem:[%s1445_s7 + $0x28] sm:$0xff] }
  0x82   :  { %v908_v50 = vpack.c.bf16 %v381_v49, %v380_v48  ;;  %v385_v55 = vld [vmem:[%s1443_s5 + $0x78] sm:$0xff]  ;;  %v659_v4 = vld [vmem:[#allocation7] ss:$0 sm:$0xff] }
  0x83   :  { %v167_v20 = vshrl.u32 %v166_v19, 7  ;;  %v914_v56 = vpack.c.bf16 %v385_v55, %v384_v54  ;;  %v467_v62 = vld [vmem:[%s1445_s7 + $0x18] sm:$0xff]  ;;  %v556_v19 = vld [vmem:[%s1447_s9 + $0x10] sm:$0xff] }
  0x84   :  { %835 = vmatpush1.bf16.msra.mxu0 %v834_v28  ;;  %887 = vmatpush3.bf16.msra.mxu1 %v886_v12  ;;  %v471_v10 = vld [vmem:[%s1445_s7 + $0x38] sm:$0xff]  ;;  %v660_v12 = vld [vmem:[#allocation8] ss:$0 sm:$0xff] }
  0x85   :  { %837 = vmatprep.subr.bf16.mxu0 %v836_v31  ;;  %889 = vmatprep.subr.bf16.mxu1 %v888_v15  ;;  %v168_v21 = vsub.s32 0, %v167_v20  ;;  %v172_v23 = vsub.s32 1, %v167_v20 }
  0x87   :  { %v169_v24 = vrot.slane %v164_v22, %v168_v21  ;;  %v173_v25 = vrot.slane %v164_v22, %v172_v23  ;;  %v557_v21 = vld [vmem:[%s1447_s9 + $0x18] sm:$0xff]  ;;  %v661_v23 = vld [vmem:[#allocation10] ss:$0 sm:$0xff] }
  0x88   :  { %839 = vmatpush1.bf16.msra.mxu0 %v838_v40  ;;  %v899_v40 = vpack.c.bf16 %v375_v39, %v374_v38  ;;  %v932_v22 = vpack.c.bf16 %v557_v21, %v556_v19 }
  0x89   :  { %841 = vmatprep.subr.bf16.mxu0 %v840_v44  ;;  %v902_v44 = vpack.c.bf16 %v377_v42, %v376_v41 }
  0x8c   :  { %843 = vmatpush1.bf16.msra.mxu0 %v842_v51  ;;  %v382_v51 = vld [vmem:[%s1443_s5 + $0x60] sm:$0xff] }
  0x8d   :  { %845 = vmatprep.subr.bf16.mxu0 %v844_v52  ;;  %v383_v52 = vld [vmem:[%s1443_s5 + $0x68] sm:$0xff] }
  0x8e   :  { %v911_v53 = vpack.c.bf16 %v383_v52, %v382_v51 }
  0x90   :  { %847 = vmatpush1.bf16.msra.mxu0 %v846_v57  ;;  %v1096_v57 = vmov 0.0  }
  0x91   :  { %849 = vmatprep.subr.bf16.mxu0 %v848_v58  ;;  %v464_v58 = vld [vmem:[%s1445_s7] sm:$0xff] }
  0x92   :  { %v917_v61 = vpack.c.bf16 %v465_v59, %v464_v58 }
  0x94   :  { %851 = vmatpush1.bf16.msra.mxu0 %v850_v63  ;;  %v920_v63 = vpack.c.bf16 %v467_v62, %v466_v60 }
  0x95   :  { %853 = vmatprep.subr.bf16.mxu0 %v852_v0  ;;  %v468_v0 = vld [vmem:[%s1445_s7 + $0x20] sm:$0xff] }
  0x96   :  { %v923_v2 = vpack.c.bf16 %v469_v1, %v468_v0 }
  0x98   :  { %855 = vmatpush1.bf16.msra.mxu0 %v854_v5 }
  0x99   :  { %857 = vmatprep.subr.bf16.mxu0 %v856_v6 }
  0x9c   :  { %859 = vmatpush1.bf16.msra.mxu0 %v858_v9  ;;  %v470_v9 = vld [vmem:[%s1445_s7 + $0x30] sm:$0xff] }
  0x9d   :  { %916 = vmatprep.subr.bf16.mxu0 %v1094_v18  ;;  %v926_v11 = vpack.c.bf16 %v471_v10, %v470_v9 }
  0x9f   :  { %252 = vmatmul.mubr.f32.vlgmr.msra.gmra.mrb[0].mxu0 %v1218_v43  ;;  %v274_v43 = vld [vmem:[%s1441_s3 + $0x70] sm:$0xff] }
  0xa0   :  { %v890_v17 = vpack.c.bf16 %v275_v16, %v274_v43  ;;  %782 = vmatprep.mubr.msk.f32.mxu0 %vm1095_vm0, %v1096_v57  ;;  %918 = vmatpush3.bf16.msra.mxu0 %v917_v61  ;;  %v554_v16 = vld [vmem:[%s1447_s9] sm:$0xff] }
  0xa1   :  { %919 = vmatprep.subr.bf16.mxu0 %v1094_v18 }
  0xa2   :  { %891 = vmatpush3.bf16.msra.mxu1 %v890_v17  ;;  %v555_v17 = vld [vmem:[%s1447_s9 + $0x8] sm:$0xff]  ;;  %s1057_s9 = scalar_lea.vmem %s648_s2, 32 }
  0xa3   :  { %892 = vmatprep.subr.bf16.mxu1 %v1094_v18  ;;  %v929_v20 = vpack.c.bf16 %v555_v17, %v554_v16  ;;  %p1058_p12 = scmp.ne.s32.totalorder %s648_s2, %s1057_s9  ;;  %p1063_p0 = scmp.lt.s32.totalorder %s1057_s9, %s1057_s9 }
  0xa4   :  { %921 = vmatpush3.bf16.msra.mxu0 %v920_v63 }
  0xa5   :  { %922 = vmatprep.subr.bf16.mxu0 %v1094_v18  ;;  %p1064_p1 = por %p1063_p0, %p1062_p13 }
  0xa7   :  { %p1065_p2 = pnand %p1064_p1, %p1058_p12 }
  0xa8   :  { %924 = vmatpush3.bf16.msra.mxu0 %v923_v2 }
  0xa9   :  { %925 = vmatprep.subr.bf16.mxu0 %v1094_v18 }
  0xac   :  { %927 = vmatpush3.bf16.msra.mxu0 %v926_v11 }
 0x172   :  { %v253_v26 = vpop.f32.mrb[0].mxu0 }
 0x173   :  { %v254_v27 = vadd.f32 %v253_v26, %v169_v24  ;;  %v255_v28 = vpop.f32.mrb[1].mxu0 }
 0x174   :  { %v256_v31 = vadd.f32 %v255_v28, %v173_v25  ;;  %v663_v28 = vld [vmem:[%s1448_s10] ss:$0 sm:$0xff] }
 0x175   :  { %v258_v34 = vmax.f32 %v254_v27, 0.0 }
 0x176   :  { %v259_v32 = vmax.f32 %v256_v31, 0.0 }
 0x178   :  { %363 = vmatprep.mubr.f32.mxu1 %v259_v32 }
 0x179   :  { %364 = vmatmul.mubr.f32.vlgmr.msra.gmra.mrb[0].mxu1 %v258_v34 }
 0x17a   :  { %894 = vmatpush3.bf16.msra.mxu1 %v893_v33  ;;  %763 = vmatprep.mubr.msk.f32.mxu1 %vm1095_vm0, %v1096_v57 }
 0x17b   :  { %895 = vmatprep.subr.bf16.mxu1 %v1094_v18 }
 0x17e   :  { %897 = vmatpush3.bf16.msra.mxu1 %v896_v37 }
 0x17f   :  { %898 = vmatprep.subr.bf16.mxu1 %v1094_v18 }
 0x182   :  { %900 = vmatpush3.bf16.msra.mxu1 %v899_v40 }
 0x183   :  { %901 = vmatprep.subr.bf16.mxu1 %v1094_v18 }
 0x186   :  { %903 = vmatpush3.bf16.msra.mxu1 %v902_v44 }
 0x187   :  { %904 = vmatprep.subr.bf16.mxu1 %v1094_v18 }
 0x18a   :  { %906 = vmatpush3.bf16.msra.mxu1 %v905_v47 }
 0x18b   :  { %907 = vmatprep.subr.bf16.mxu1 %v1094_v18 }
 0x18e   :  { %909 = vmatpush3.bf16.msra.mxu1 %v908_v50 }
 0x18f   :  { %910 = vmatprep.subr.bf16.mxu1 %v1094_v18 }
 0x192   :  { %912 = vmatpush3.bf16.msra.mxu1 %v911_v53 }
 0x193   :  { %913 = vmatprep.subr.bf16.mxu1 %v1094_v18 }
 0x196   :  { %915 = vmatpush3.bf16.msra.mxu1 %v914_v56 }
 0x197   :  { %928 = vmatprep.subr.bf16.mxu1 %v1094_v18 }
 0x24c   :  { %v697_v3 = vpop.f32.mrb[0].mxu1 }
 0x24d   :  { %v698_v5 = vpop.f32.mrb[1].mxu1 }
 0x24e   :  { %v699_v6 = vadd.f32 %v698_v5, %v697_v3 }
 0x250   :  { %v366_v7 = vadd.f32 %v699_v6, %v659_v4 }
 0x252   :  { %v369_v8 = vmax.f32 %v366_v7, 0.0 }
 0x254   :  { %764 = vmatmul.mubr.f32.vlgmr.msra.gmra.mrb[2].mxu1 %v369_v8 }
 0x255   :  { %793 = vmatprep.mubr.msk.f32.mxu1 %vm1095_vm0, %v1096_v57  ;;  %930 = vmatpush3.bf16.msra.mxu1 %v929_v20 }
 0x256   :  { %931 = vmatprep.subr.bf16.mxu1 %v1094_v18 }
 0x259   :  { %933 = vmatpush3.bf16.msra.mxu1 %v932_v22 }
 0x327   :  { %v459_v13 = vpop.f32.mrb[2].mxu1 }
 0x328   :  { %v460_v14 = vadd.f32 %v660_v12, %v459_v13  ;;  %v765_v15 = vpop.f32.mrb[3].mxu1 }
 0x32a   :  { %v463_v43 = vmax.f32 %v460_v14, 0.0 }
 0x32c   :  { %783 = vmatmul.mubr.msk.f32.vlgmr.msra.gmra.mrb[2].mxu0 %vm479_vm1, %v463_v43 }
 0x3ff   :  { %v549_v24 = vpop.f32.mrb[2].mxu0 }
 0x400   :  { %v550_v25 = vadd.f32 %v661_v23, %v549_v24  ;;  %v784_v26 = vpop.f32.mrb[3].mxu0 }
 0x402   :  { %945 = vtanh.f32 %v550_v25 }
 0x40c   :  { %v946_v27 = vpop.eup %945 }
 0x40d   :  { %794 = vmatmul.mubr.msk.f32.vlgmr.msra.gmra.mrb[4].mxu1 %vm565_vm2, %v946_v27 }
 0x4e0   :  { %v635_v29 = vpop.f32.mrb[4].mxu1 }
 0x4e1   :  { %v636_v30 = vadd.f32 %v663_v28, %v635_v29  ;;  %v795_v31 = vpop.f32.mrb[5].mxu1 }
 0x4e3   :  { %640 = vst.msk [vmem:[#allocation11] sm:$0x3] %vm639_vm3, %v636_v30 }
 0x4e4   :  { %1068 = shalt.err (!%p1065_p2)
}
 0x4e5   :  { %s1069_s8 = scalar_lea.hbm %s1449_s11, 32 }
 0x4e6   :  { %p1070_p3 = scmp.ne.s32.totalorder %s1449_s11, %s1069_s8  ;;  %p1073_p4 = scmp.lt.u32.totalorder %s1069_s8, %s1449_s11 }
 0x4e8   :  { %p1075_p5 = pnand %p1073_p4, %p1070_p3 }
 0x4ea   :  { %1078 = shalt.err (!%p1075_p5)
}
 0x4eb   :  { %650 = dma.vmem_to_hbm [thread:$0]  %s648_s2, 32, %s1449_s11, [#allocation4]  }
 0x4ec   :  { %1085 = dma.done.wait [#allocation4], 32  }
 0x4ed   :  { %1086 = vsyncadd [#allocation4], 4294967264 }
 0x4ee   :  { %654 = vsyncpa [#allocation3], 1 }
 0x4ef   :  { %655 = vsyncpa [#allocation6], 1 }
 0x4f0   :  { %656 = vsyncpa [#allocation9], 1 }
 0x4f1   :  { %657 = vsyncpa [#allocation4], 1 }

</bundles_post_ra>
